<compile_context>
chip_gen: v7x
topology: tpu7x:2x2x1
jax: 0.10.0
libtpu: 0.0.40
codegen_flags: <defaults>
</compile_context>

<pallas_src>
import jax
import jax.numpy as jnp
from jax.experimental import pallas as pl
from jax.experimental.pallas import tpu as pltpu


def _round_up(x: int, m: int) -> int:
    return ((x + m - 1) // m) * m


# ----------------------------- Pallas kernel --------------------------------

def _make_patch_embed_kernel(precision):
    def kernel(p_ref, w_ref, b_ref, o_ref):
        # p_ref: (tm, Kp), w_ref: (Kp, tn) in compute dtype
        # b_ref: (1, tn) f32, o_ref: (tm, tn) out dtype
        acc = jnp.dot(p_ref[...], w_ref[...],
                      preferred_element_type=jnp.float32, precision=precision)
        o_ref[...] = (acc + b_ref[...]).astype(o_ref.dtype)
    return kernel


def _pick_tn(E: int, max_tn: int) -> int:
    """Lane-dim tile: full E if it fits, else a 128-multiple (divisor of E if possible)."""
    if E <= max_tn:
        return E                      # full-extent block is always layout-legal
    for cand in range(max_tn, 127, -128):
        if E % cand == 0:
            return cand               # even split -> no ragged E tile
    return max_tn                     # ragged last tile, masked by Pallas


def _pick_tm(M: int, max_tm: int, sub: int = 16) -> int:
    """Row tile: large, sublane-aligned, and >=2 tiles when possible (megacore)."""
    if M <= sub:
        return M                      # tiny: single full-extent tile
    if M <= max_tm:
        return min(_round_up(pl.cdiv(M, 2), sub), max_tm)   # >=2 M tiles for v7x
    return max_tm


def patch_embed_matmul(patches: jax.Array, weight_2d: jax.Array, bias2d: jax.Array,
                       *, out_dtype, max_tm: int = 512, max_tn: int = 1024,
                       precision=None) -> jax.Array:
    """out[m, e] = sum_k patches[m, k] * weight_2d[k, e] + bias2d[0, e]

    patches:   (M, K)            compute dtype (bf16 or f32)
    weight_2d: (K, E) or (Kp, E) same dtype as patches (Kp = round_up(K, 128))
    bias2d:    (1, E)            f32 (added to the f32 accumulator in-kernel)
    """
    M, K = patches.shape
    Kw, E = weight_2d.shape
    assert bias2d.shape == (1, E), bias2d.shape
    assert max_tn % 128 == 0 and max_tm % 16 == 0

    # Pad the contraction dim to a 128 multiple (lane-dense loads, full MXU feed).
    Kp = _round_up(K, 128)
    assert Kw in (K, Kp), (Kw, K, Kp)
    if Kp != K:
        patches = jnp.pad(patches, ((0, 0), (0, Kp - K)))
    if Kw != Kp:
        weight_2d = jnp.pad(weight_2d, ((0, Kp - Kw), (0, 0)))

    tn = _pick_tn(E, max_tn)
    tm = _pick_tm(M, max_tm)

    # Grid: E tiles outer, M tiles inner -> the weight/bias tile block index is
    # constant along the inner axis, so Pallas keeps it resident (no re-DMA),
    # while patch rows stream.  Ragged boundary tiles (last M / last E) are
    # masked by Pallas; out-of-bounds input rows/cols only feed out-of-bounds
    # output elements, which are never written back.
    grid = (pl.cdiv(E, tn), pl.cdiv(M, tm))

    out = pl.pallas_call(
        _make_patch_embed_kernel(precision),
        out_shape=jax.ShapeDtypeStruct((M, E), out_dtype),
        grid_spec=pltpu.PrefetchScalarGridSpec(
            num_scalar_prefetch=0,
            grid=grid,
            in_specs=[
                pl.BlockSpec((tm, Kp), lambda j, i: (i, 0)),   # patch rows
                pl.BlockSpec((Kp, tn), lambda j, i: (0, j)),   # weight columns
                pl.BlockSpec((1, tn), lambda j, i: (0, j)),    # bias row (f32)
            ],
            out_specs=pl.BlockSpec((tm, tn), lambda j, i: (i, j)),
        ),
        compiler_params=pltpu.CompilerParams(
            dimension_semantics=("parallel", "parallel")),
    )(patches, weight_2d, bias2d)
    return out


# ----------------------------- JAX glue / module ----------------------------

def _to_2tuple(v):
    if isinstance(v, (tuple, list)):
        assert len(v) == 2
        return (int(v[0]), int(v[1]))
    return (int(v), int(v))


def _extract_patches(x: jax.Array, patch_size, strides):
    """x: (B, C, H, W) -> (B*nH*nW, C*ph*pw); patch vector ordered (C, kh, kw)."""
    B, C, H, W = x.shape
    ph, pw = patch_size
    sh, sw = strides
    nH = (H - ph) // sh + 1
    nW = (W - pw) // sw + 1
    if (sh, sw) == (ph, pw) and H == nH * ph and W == nW * pw:
        # Non-overlapping patches: pure reshape + one transpose (no gather).
        p = x.reshape(B, C, nH, ph, nW, pw)
        p = jnp.transpose(p, (0, 2, 4, 1, 3, 5))             # (B, nH, nW, C, ph, pw)
        return p.reshape(B * nH * nW, C * ph * pw), nH, nW
    # General strided (possibly overlapping) conv: gather path.
    idx_h = (jnp.arange(nH) * sh)[:, None] + jnp.arange(ph)[None, :]   # (nH, ph)
    idx_w = (jnp.arange(nW) * sw)[:, None] + jnp.arange(pw)[None, :]   # (nW, pw)
    xh = x[:, :, idx_h, :]                                    # (B, C, nH, ph, W)
    xhw = xh[:, :, :, :, idx_w]                               # (B, C, nH, ph, nW, pw)
    p = jnp.transpose(xhw, (0, 2, 4, 1, 3, 5))                # (B, nH, nW, C, ph, pw)
    return p.reshape(B * nH * nW, C * ph * pw), nH, nW


class FlexiPatchEmbedPallas:
    """JAX/Pallas port of FlexiPatchEmbed (norm_layer=None -> Identity)."""

    def __init__(self, patch_size=(16, 16), strides=(16, 16), in_chans=1,
                 embed_dim=192, bias=True, flatten=True, *, key,
                 compute_dtype=jnp.bfloat16, out_dtype=None):
        self.patch_size = _to_2tuple(patch_size)
        self.strides = _to_2tuple(strides)
        self.flatten = flatten
        self.compute_dtype = compute_dtype
        self.out_dtype = out_dtype      # None -> match input dtype (PyTorch parity)
        self.embed_dim = embed_dim
        self.in_chans = in_chans
        ph, pw = self.patch_size

        # lecun_normal_ on conv weight (E, C, ph, pw): fan_in = C*ph*pw, trunc normal.
        init = jax.nn.initializers.variance_scaling(
            1.0, "fan_in", "truncated_normal", in_axis=(1, 2, 3), out_axis=0)
        self.weight = init(key, (embed_dim, in_chans, ph, pw), jnp.float32)
        self.bias = jnp.zeros((embed_dim,), jnp.float32) if bias else None

        # Precompute the transposed + K-padded weight and bias row once (kept in
        # compute dtype / f32) instead of reshaping + padding every forward.
        K = in_chans * ph * pw
        Kp = _round_up(K, 128)
        w2d = self.weight.reshape(embed_dim, K).T                      # (K, E)
        if Kp != K:
            w2d = jnp.pad(w2d, ((0, Kp - K), (0, 0)))
        self.w2d = w2d.astype(compute_dtype)                           # (Kp, E)
        b = self.bias if self.bias is not None else jnp.zeros((embed_dim,), jnp.float32)
        self.bias2d = b.reshape(1, embed_dim).astype(jnp.float32)

    def __call__(self, x: jax.Array, patch_size=None, strides=None) -> jax.Array:
        B, C, H, W = x.shape
        patch_size = self.patch_size if patch_size is None else _to_2tuple(patch_size)
        strides = self.strides if strides is None else _to_2tuple(strides)
        if patch_size != self.patch_size:
            # TODO(synk): resample_patch_embed (pinv of bilinear-resize matrix) weight
            # resizing path not ported; only the native-patch-size conv path runs here.
            raise NotImplementedError("flexible patch resizing not implemented")

        cd = self.compute_dtype
        # Cast BEFORE the patch transpose: the extraction pass moves compute-dtype
        # bytes and the cast fuses into the transpose (no separate HBM pass).
        patches, nH, nW = _extract_patches(x.astype(cd), patch_size, strides)  # (M, K)

        precision = (jax.lax.Precision.HIGHEST
                     if jnp.dtype(cd) == jnp.dtype(jnp.float32) else None)
        out_dtype = x.dtype if self.out_dtype is None else self.out_dtype
        out = patch_embed_matmul(patches, self.w2d, self.bias2d,
                                 out_dtype=out_dtype, precision=precision)      # (M, E)
        out = out.reshape(B, nH * nW, self.embed_dim)     # == flatten(2).transpose(1,2)
        if not self.flatten:
            out = out.reshape(B, nH, nW, self.embed_dim).transpose(0, 3, 1, 2)
        # norm_layer defaults to None -> Identity
        return out


# ----------------------------------- main ------------------------------------

if __name__ == "__main__":
    key = jax.random.PRNGKey(0)
    k_w, k_x, k_p, k_q = jax.random.split(key, 4)

    # ---- Test 1: module forward at small shapes (single tile path) ----------
    B, C, H, W = 2, 4, 16, 16
    patch = (8, 8)
    embed_dim = 32

    module = FlexiPatchEmbedPallas(patch_size=patch, strides=patch,
                                   in_chans=C, embed_dim=embed_dim, key=k_w)
    x = jax.random.normal(k_x, (B, C, H, W), jnp.float32)
    y = jax.block_until_ready(module(x))

    # Pure-JAX reference matching the kernel's bf16-input / f32-accumulate GEMM.
    patches_ref, nH, nW = _extract_patches(x.astype(jnp.bfloat16), patch, patch)
    p_ref = patches_ref.astype(jnp.float32)
    w_ref = module.weight.reshape(embed_dim, -1).T.astype(jnp.bfloat16).astype(jnp.float32)
    ref = jnp.dot(p_ref, w_ref, precision=jax.lax.Precision.HIGHEST) + module.bias
    ref = ref.reshape(B, nH * nW, embed_dim)

    assert y.shape == (B, (H // patch[0]) * (W // patch[1]), embed_dim), y.shape
    assert y.dtype == x.dtype, y.dtype
    assert jnp.allclose(y, ref, atol=2e-3, rtol=2e-3), "mismatch vs reference (module)"

    # ---- Test 2: ragged M tile, multi-E-tile, unaligned-K GEMM path ---------
    M2, K2, E2 = 300, 588, 1280        # K2 padded to 640; E2 split into 2 tiles of 640
    a = jax.random.normal(k_p, (M2, K2), jnp.float32).astype(jnp.bfloat16)
    w = jax.random.normal(k_q, (K2, E2), jnp.float32).astype(jnp.bfloat16)
    b2 = jnp.full((1, E2), 0.5, jnp.float32)
    y2 = jax.block_until_ready(patch_embed_matmul(a, w, b2, out_dtype=jnp.float32))
    ref2 = jnp.dot(a.astype(jnp.float32), w.astype(jnp.float32),
                   precision=jax.lax.Precision.HIGHEST) + b2
    assert y2.shape == (M2, E2), y2.shape
    assert jnp.allclose(y2, ref2, atol=5e-2, rtol=1e-2), "mismatch vs reference (GEMM)"

    print("KERNEL_OK")
</pallas_src>

<mosaic_0001>
module attributes {stable_mosaic.version = 11 : i64} {
  func.func @kernel(%arg0: i32, %arg1: i32, %arg2: memref<8x256xbf16, #tpu.memory_space<vmem>>, %arg3: memref<256x32xbf16, #tpu.memory_space<vmem>>, %arg4: memref<1x32xf32, #tpu.memory_space<vmem>>, %arg5: memref<8x32xf32, #tpu.memory_space<vmem>>) attributes {dimension_semantics = [#tpu.dimension_semantics<parallel>, #tpu.dimension_semantics<parallel>], iteration_bounds = array<i64: 1, 1>, scalar_prefetch = 0 : i64, scratch_operands = 0 : i64, tpu.core_type = #tpu.core_type<tc>, window_params = [{transform_indices = @transform_0, window_bounds = array<i64: 8, 256>}, {transform_indices = @transform_1, window_bounds = array<i64: 256, 32>}, {transform_indices = @transform_2, window_bounds = array<i64: 1, 32>}, {transform_indices = @transform_3, window_bounds = array<i64: 8, 32>}]} {
    %c0 = arith.constant 0 : index
    %c0_0 = arith.constant 0 : index
    %0 = vector.load %arg2[%c0, %c0_0] : memref<8x256xbf16, #tpu.memory_space<vmem>>, vector<8x256xbf16>
    %c0_1 = arith.constant 0 : index
    %c0_2 = arith.constant 0 : index
    %1 = vector.load %arg3[%c0_1, %c0_2] : memref<256x32xbf16, #tpu.memory_space<vmem>>, vector<256x32xbf16>
    %cst = arith.constant dense<0.000000e+00> : vector<8x32xf32>
    %2 = tpu.matmul %0, %1, %cst {dimension_numbers = #tpu.dot_dimension_numbers<[1], [0], [0], [1], [0, 0, 1, 1], [], []>} : vector<8x256xbf16>, vector<256x32xbf16>, vector<8x32xf32> -> vector<8x32xf32>
    %c0_3 = arith.constant 0 : index
    %c0_4 = arith.constant 0 : index
    %3 = vector.load %arg4[%c0_3, %c0_4] : memref<1x32xf32, #tpu.memory_space<vmem>>, vector<1x32xf32>
    %4 = vector.broadcast %3 : vector<1x32xf32> to vector<8x32xf32>
    %5 = arith.addf %2, %4 : vector<8x32xf32>
    %c0_5 = arith.constant 0 : index
    %c0_6 = arith.constant 0 : index
    %6 = vector.load %arg5[%c0_5, %c0_6] : memref<8x32xf32, #tpu.memory_space<vmem>>, vector<8x32xf32>
    tpu.vector_store %arg5[%c0_5, %c0_6], %5 {strides = array<i32>} : memref<8x32xf32, #tpu.memory_space<vmem>>, vector<8x32xf32>,
    return
  }
  func.func @transform_0(%arg0: i32, %arg1: i32) -> (i32, i32) {
    %c0_i32 = arith.constant 0 : i32
    %c0_i32_0 = arith.constant 0 : i32
    return %arg1, %c0_i32 : i32, i32
  }
  func.func @transform_1(%arg0: i32, %arg1: i32) -> (i32, i32) {
    %c0_i32 = arith.constant 0 : i32
    %c0_i32_0 = arith.constant 0 : i32
    return %c0_i32, %arg0 : i32, i32
  }
  func.func @transform_2(%arg0: i32, %arg1: i32) -> (i32, i32) {
    %c0_i32 = arith.constant 0 : i32
    %c0_i32_0 = arith.constant 0 : i32
    return %c0_i32, %arg0 : i32, i32
  }
  func.func @transform_3(%arg0: i32, %arg1: i32) -> (i32, i32) {
    %c0_i32 = arith.constant 0 : i32
    return %arg1, %arg0 : i32, i32
  }
}

</mosaic_0001>

<bundles_post_ra>
// kernel: tpu_custom_call.1
= control target key start
LH: loop header
LB: loop body
LE: loop exit
PB: predicated region body
PF: predicated region fallthrough
CT: control target
= control target key end

     0   :  { %s386_s0 = inlined_call_operand.vmem [shape: bf16[8,256], index: 0, kind: input, shape index: {}]   ;;  %s387_s1 = inlined_call_operand.vmem [shape: bf16[256,32], index: 1, kind: input, shape index: {}]   ;;  %s388_s2 = inlined_call_operand.vmem [shape: f32[1,32], index: 2, kind: input, shape index: {}]   ;;  %s389_s3 = inlined_call_operand.hbm [shape: f32[8,32], index: 3, kind: output, shape index: {}]  }
   0x1   :  { %v257_v0 = vld [vmem:[%s387_s1 + $0x40] sm:$0xff]   ;;  %v259_v2 = vld [vmem:[%s387_s1 + $0x48] sm:$0xff]   ;;  %v261_v4 = vld [vmem:[%s387_s1 + $0x50] sm:$0xff]  }
   0x2   :  { %v258_v1 = vld [vmem:[%s387_s1] sm:$0xff]   ;;  %234 = vmatprep.subr.bf16.mxu0 %v257_v0  ;;  %v260_v3 = vld [vmem:[%s387_s1 + $0x8] sm:$0xff]   ;;  %v262_v5 = vld [vmem:[%s387_s1 + $0x10] sm:$0xff]  }
   0x3   :  { %235 = vmatpush3.bf16.msra.mxu0 %v258_v1  ;;  %v263_v6 = vld [vmem:[%s387_s1 + $0x58] sm:$0xff]   ;;  %v265_v8 = vld [vmem:[%s387_s1 + $0x60] sm:$0xff]   ;;  %v267_v10 = vld [vmem:[%s387_s1 + $0x68] sm:$0xff]  }
   0x4   :  { %236 = vmatprep.subr.bf16.mxu0 %v259_v2  ;;  %v264_v7 = vld [vmem:[%s387_s1 + $0x18] sm:$0xff]   ;;  %v266_v9 = vld [vmem:[%s387_s1 + $0x20] sm:$0xff]  }
   0x5   :  { %v16_v11 = vld [vmem:[%s386_s0] sm:$0xff] }
   0x7   :  { %237 = vmatpush3.bf16.msra.mxu0 %v260_v3 }
   0x8   :  { %238 = vmatprep.subr.bf16.mxu0 %v261_v4 }
   0xb   :  { %239 = vmatpush3.bf16.msra.mxu0 %v262_v5 }
   0xc   :  { %240 = vmatprep.subr.bf16.mxu0 %v263_v6 }
   0xf   :  { %241 = vmatpush3.bf16.msra.mxu0 %v264_v7 }
  0x10   :  { %242 = vmatprep.subr.bf16.mxu0 %v265_v8 }
  0x11   :  { %8 = vsyncpa [#allocation3], 0  ;;  %v217_v12 = vcombine.high %v16_v11, %v16_v11  ;;  %v268_v13 = vld [vmem:[%s387_s1 + $0x28] sm:$0xff]   ;;  %v269_v14 = vld [vmem:[%s387_s1 + $0x70] sm:$0xff]   ;;  %v216_v18 = vcombine.low %v16_v11, %v16_v11  ;;  %s299_s20 = smov [#allocation2]   ;;  %vm199_vm0 = vcmask 261120  }
  0x12   :  { %v270_v15 = vld [vmem:[%s387_s1 + $0x30] sm:$0xff]   ;;  %v271_v16 = vld [vmem:[%s387_s1 + $0x78] sm:$0xff]   ;;  %v215_v20 = vld [vmem:[%s388_s2] ss:$0 sm:$0xff]  ;;  %s207_s21 = sshll.u32 %s299_s20, 4  ;;  %s208_s21 = int_to_ptr.vmem [resolvable:$true] %s207_s21 }
  0x13   :  { %243 = vmatpush3.bf16.msra.mxu0 %v266_v9  ;;  %191 = vmatprep.mubr.bf16.mxu0 %v217_v12  ;;  %v272_v17 = vld [vmem:[%s387_s1 + $0x38] sm:$0xff]   ;;  %s275_s1 = scalar_lea.vmem %s208_s21, 128  ;;  %p280_p1 = scmp.lt.s32.totalorder %s208_s21, %s208_s21 }
  0x14   :  { %244 = vmatprep.subr.bf16.mxu0 %v267_v10  ;;  %p276_p0 = scmp.ne.s32.totalorder %s208_s21, %s275_s1  ;;  %p281_p2 = scmp.lt.s32.totalorder %s275_s1, %s275_s1 }
  0x16   :  { %p282_p3 = por %p281_p2, %p280_p1 }
  0x17   :  { %245 = vmatpush3.bf16.msra.mxu0 %v268_v13 }
  0x18   :  { %246 = vmatprep.subr.bf16.mxu0 %v269_v14  ;;  %p283_p4 = pnand %p282_p3, %p276_p0 }
  0x1b   :  { %247 = vmatpush3.bf16.msra.mxu0 %v270_v15 }
  0x1c   :  { %248 = vmatprep.subr.bf16.mxu0 %v271_v16 }
  0x1f   :  { %249 = vmatpush3.bf16.msra.mxu0 %v272_v17 }
  0x22   :  { %192 = vmatmul.mubr.bf16.vlgmr.msra.gmra.mrb[0].mxu0 %v216_v18 }
  0xf5   :  { %v250_v19 = vpop.f32.mrb[0].mxu0 }
  0xf6   :  { %v251_v21 = vpop.f32.mrb[1].mxu0 }
  0xf7   :  { %v252_v22 = vadd.f32 %v251_v21, %v250_v19  ;;  %v253_v23 = vpop.f32.mrb[2].mxu0 }
  0xf8   :  { %v254_v24 = vpop.f32.mrb[3].mxu0 }
  0xf9   :  { %v194_v25 = vadd.f32 %v252_v22, %v215_v20 }
  0xfb   :  { %200 = vst.msk [vmem:[#allocation2] sm:$0xff] %vm199_vm0, %v194_v25 }
  0xfc   :  { %286 = shalt.err (!%p283_p4)
}
  0xfd   :  { %s287_s2 = scalar_lea.hbm %s389_s3, 128 }
  0xfe   :  { %p288_p5 = scmp.ne.s32.totalorder %s389_s3, %s287_s2  ;;  %p291_p6 = scmp.lt.u32.totalorder %s287_s2, %s389_s3 }
 0x100   :  { %p293_p7 = pnand %p291_p6, %p288_p5 }
 0x102   :  { %296 = shalt.err (!%p293_p7)
}
 0x103   :  { %210 = dma.vmem_to_hbm [thread:$0]  %s208_s21, 128, %s389_s3, [#allocation3]  }
 0x104   :  { %297 = dma.done.wait [#allocation3], 128  }
 0x105   :  { %298 = vsyncadd [#allocation3], 4294967168 }
 0x106   :  { %214 = vsyncpa [#allocation3], 1 }

</bundles_post_ra>
